<compile_context>
chip_gen: v7x
topology: tpu7x:2x2x1
jax: 0.10.0
libtpu: 0.0.40
codegen_flags: <defaults>
</compile_context>

<pallas_src>
import numpy as np
import jax
import jax.numpy as jnp
from jax.experimental import pallas as pl
from jax.experimental.pallas import tpu as pltpu

BN_EPS = 1e-5
FEAT_PAD = 128     # feature_dim padded to full lane width
PATH_PAD = 128     # path_count padded to full lane width (lane-dense output)
NEG_BIG = -1e30    # pad-logit bias -> exp underflows to exactly 0


def soft_routing_kernel(x_ref, w1_ref, packed_ref, out_ref):
    feat_pad = w1_ref.shape[1]          # 128
    n = x_ref.shape[0]

    # --- fc1 (AvgPool+Flatten pre-folded into w1); x cast to bf16 in-kernel,
    #     bf16 MXU operands with f32 accumulation ---
    x_bf = x_ref[...].astype(jnp.bfloat16)
    h = jnp.dot(x_bf, w1_ref[...], preferred_element_type=jnp.float32)   # (N,128)

    # --- BatchNorm1d (training mode, biased variance), single-pass stats ---
    inv_n = 1.0 / n
    s1 = jnp.sum(h, axis=0, keepdims=True)
    s2 = jnp.sum(h * h, axis=0, keepdims=True)
    mean = s1 * inv_n
    var = s2 * inv_n - mean * mean
    gamma = packed_ref[feat_pad:feat_pad + 1, :]
    beta = packed_ref[feat_pad + 1:feat_pad + 2, :]
    a = gamma * jax.lax.rsqrt(var + BN_EPS)     # pad lanes: gamma=0 -> a=0
    c = beta - mean * a
    h_bn = h * a + c                            # pad lanes exactly 0

    # --- fc2 (1/temperature pre-folded); bf16 operands, f32 accumulate ---
    w2 = packed_ref[0:feat_pad, :].astype(jnp.bfloat16)
    b2 = packed_ref[feat_pad + 2:feat_pad + 3, :]
    logits = jnp.dot(h_bn.astype(jnp.bfloat16), w2,
                     preferred_element_type=jnp.float32) + b2            # (N,128)

    # --- softmax over paths (pad logits = -1e30 -> contribute exactly 0) ---
    m = jnp.max(logits, axis=-1, keepdims=True)
    e = jnp.exp(logits - m)
    s = jnp.sum(e, axis=-1, keepdims=True)
    out_ref[...] = e * pl.reciprocal(s, approx=True)


def build_pool_matrix(C, H, W, s):
    """Constant matrix implementing AvgPool2d(kernel=s, stride=s) + Flatten on a
    row-major-flattened NCHW tensor.  Only used once at param-prep time."""
    Hp, Wp = H // s, W // s
    P = np.zeros((C * H * W, C * Hp * Wp), dtype=np.float32)
    inv = 1.0 / float(s * s)
    for c in range(C):
        for h in range(H):
            for w in range(W):
                row = (c * H + h) * W + w
                col = (c * Hp + h // s) * Wp + w // s
                P[row, col] = inv
    return jnp.asarray(P)


def init_params(key, lin_in_dim, feature_dim, path_count):
    k1, k2, k3, k4 = jax.random.split(key, 4)
    # fc1 / fc2 weights stored as (in, out) so the math is x @ W + b
    lim1 = 1.0 / np.sqrt(lin_in_dim)
    lim2 = 1.0 / np.sqrt(feature_dim)
    return dict(
        w1=jax.random.uniform(k1, (lin_in_dim, feature_dim), jnp.float32, -lim1, lim1),
        b1=jax.random.uniform(k2, (1, feature_dim), jnp.float32, -lim1, lim1),
        gamma=jnp.ones((1, feature_dim), jnp.float32),   # BatchNorm1d default init
        beta=jnp.zeros((1, feature_dim), jnp.float32),
        w2=jax.random.uniform(k3, (feature_dim, path_count), jnp.float32, -lim2, lim2),
        b2=jax.random.uniform(k4, (1, path_count), jnp.float32, -lim2, lim2),
    )


def prepare_routing_params(params, pool_mat, temperature):
    """One-time weight preparation (hoisted out of the per-call forward).

    * AvgPool+Flatten folded into fc1 weights.
    * b1 dropped: a per-feature bias before training-mode BatchNorm cancels exactly.
    * 1/temperature folded into fc2 weights/bias.
    * feature dim zero-padded to 128 lanes, paths padded to 128 lanes with -1e30 bias.
    * w2 + gamma + beta + b2 packed into ONE f32 buffer (fewer input DMAs).
    """
    feat = params["w1"].shape[1]
    paths = params["w2"].shape[1]
    assert feat <= FEAT_PAD and paths <= PATH_PAD

    fused = jnp.dot(pool_mat, params["w1"])                          # (C*H*W, feat)
    fused_w1 = (jnp.zeros((pool_mat.shape[0], FEAT_PAD), jnp.float32)
                .at[:, :feat].set(fused).astype(jnp.bfloat16))       # (C*H*W, 128)

    w2_t = (jnp.zeros((FEAT_PAD, PATH_PAD), jnp.float32)
            .at[:feat, :paths].set(params["w2"] / temperature))      # (128, 128)
    b2_t = (jnp.full((PATH_PAD,), NEG_BIG, jnp.float32)
            .at[:paths].set(params["b2"].reshape(-1) / temperature)) # (128,)

    packed = jnp.zeros((FEAT_PAD + 8, PATH_PAD), jnp.float32)
    packed = packed.at[:FEAT_PAD, :].set(w2_t)
    packed = packed.at[FEAT_PAD, :feat].set(params["gamma"].reshape(-1))
    packed = packed.at[FEAT_PAD + 1, :feat].set(params["beta"].reshape(-1))
    packed = packed.at[FEAT_PAD + 2, :].set(b2_t)

    return dict(fused_w1=fused_w1, packed=packed, paths=paths)


def soft_routing_forward(prepped, layer_input, labels, balance_coefficient):
    # labels / balance_coefficient accepted for API parity but unused by the forward
    # output (exactly like the PyTorch module in the from_logits branch).
    # temperature is already folded into the prepared fc2 weights/bias.
    del labels, balance_coefficient
    N = layer_input.shape[0]
    x_flat = layer_input.reshape(N, -1)            # f32; bf16 cast happens in-kernel

    vmem = pl.BlockSpec(memory_space=pltpu.MemorySpace.VMEM)
    out = pl.pallas_call(
        soft_routing_kernel,
        out_shape=jax.ShapeDtypeStruct((N, PATH_PAD), jnp.float32),
        in_specs=[vmem, vmem, vmem],
        out_specs=vmem,
    )(x_flat, prepped["fused_w1"], prepped["packed"])
    return out[:, :prepped["paths"]]


def reference_forward(params, layer_input, temperature, s):
    # Pure-JAX f32 reference implementing the original PyTorch math
    # (AvgPool2d + Flatten + fc1(+b1) + BatchNorm1d(train) + fc2 + temp + softmax).
    N, C, H, W = layer_input.shape
    Hp, Wp = H // s, W // s
    pooled = layer_input.reshape(N, C, Hp, s, Wp, s).mean(axis=(3, 5))
    flat = pooled.reshape(N, -1)
    h = flat @ params["w1"] + params["b1"]
    mean = h.mean(axis=0, keepdims=True)
    var = ((h - mean) ** 2).mean(axis=0, keepdims=True)
    h_bn = (h - mean) / jnp.sqrt(var + BN_EPS) * params["gamma"] + params["beta"]
    act = h_bn @ params["w2"] + params["b2"]
    return jax.nn.softmax(act / temperature, axis=1)


if __name__ == "__main__":
    # Module configuration
    N = 4                      # batch
    C = 4                      # input_feature_map_count
    HW = 16                    # input_feature_map_size
    avg_pool_stride = 2
    feature_dim = 32
    path_count = 4
    lin_in_dim = int(C * (HW / avg_pool_stride) * (HW / avg_pool_stride))  # 256

    key = jax.random.PRNGKey(0)
    k_x, k_p = jax.random.split(key)
    x = jax.random.normal(k_x, (N, C, HW, HW), jnp.float32)
    labels = jnp.zeros((N,), jnp.int32)        # unused by the forward output
    temperature = 1.5
    balance_coefficient = 1.0                  # unused in the from_logits branch

    params = init_params(k_p, lin_in_dim, feature_dim, path_count)
    pool_mat = build_pool_matrix(C, HW, HW, avg_pool_stride)

    # One-time weight preparation (hoisted out of the per-call forward path).
    prepped = prepare_routing_params(params, pool_mat, temperature)
    prepped = jax.tree_util.tree_map(
        lambda v: jax.block_until_ready(v) if isinstance(v, jax.Array) else v, prepped)

    p_n_given_x = soft_routing_forward(prepped, x, labels, balance_coefficient)
    p_n_given_x = jax.block_until_ready(p_n_given_x)

    ref = reference_forward(params, x, temperature, avg_pool_stride)
    # bf16 MXU operands (f32 accumulate) + approx reciprocal introduce a small,
    # bounded deviation from the pure-f32 reference; tolerance sized accordingly.
    np.testing.assert_allclose(np.asarray(p_n_given_x), np.asarray(ref),
                               rtol=2e-2, atol=5e-3)
    assert p_n_given_x.shape == (N, path_count)

    print("KERNEL_OK")
</pallas_src>

<mosaic_0001>
module attributes {stable_mosaic.version = 11 : i64} {
  func.func @soft_routing_kernel(%arg0: memref<4x1024xf32, #tpu.memory_space<vmem>>, %arg1: memref<1024x128xbf16, #tpu.memory_space<vmem>>, %arg2: memref<136x128xf32, #tpu.memory_space<vmem>>, %arg3: memref<4x128xf32, #tpu.memory_space<vmem>>) attributes {dimension_semantics = [], scalar_prefetch = 0 : i64, scratch_operands = 0 : i64, tpu.core_type = #tpu.core_type<tc>} {
    %c0 = arith.constant 0 : index
    %c0_0 = arith.constant 0 : index
    %0 = vector.load %arg0[%c0, %c0_0] : memref<4x1024xf32, #tpu.memory_space<vmem>>, vector<4x1024xf32>
    %1 = arith.truncf %0 : vector<4x1024xf32> to vector<4x1024xbf16>
    %c0_1 = arith.constant 0 : index
    %c0_2 = arith.constant 0 : index
    %2 = vector.load %arg1[%c0_1, %c0_2] : memref<1024x128xbf16, #tpu.memory_space<vmem>>, vector<1024x128xbf16>
    %cst = arith.constant dense<0.000000e+00> : vector<4x128xf32>
    %3 = tpu.matmul %1, %2, %cst {dimension_numbers = #tpu.dot_dimension_numbers<[1], [0], [0], [1], [0, 0, 1, 1], [], []>} : vector<4x1024xbf16>, vector<1024x128xbf16>, vector<4x128xf32> -> vector<4x128xf32>
    %cst_3 = arith.constant dense<0.000000e+00> : vector<128xf32>
    %4 = vector.multi_reduction <add>, %3, %cst_3 [0] : vector<4x128xf32> to vector<128xf32>
    %5 = vector.shape_cast %4 : vector<128xf32> to vector<1x128xf32>
    %6 = arith.mulf %3, %3 : vector<4x128xf32>
    %cst_4 = arith.constant dense<0.000000e+00> : vector<128xf32>
    %7 = vector.multi_reduction <add>, %6, %cst_4 [0] : vector<4x128xf32> to vector<128xf32>
    %8 = vector.shape_cast %7 : vector<128xf32> to vector<1x128xf32>
    %cst_5 = arith.constant 2.500000e-01 : f32
    %9 = vector.broadcast %cst_5 : f32 to vector<1x128xf32>
    %10 = arith.mulf %5, %9 : vector<1x128xf32>
    %cst_6 = arith.constant 2.500000e-01 : f32
    %11 = vector.broadcast %cst_6 : f32 to vector<1x128xf32>
    %12 = arith.mulf %8, %11 : vector<1x128xf32>
    %13 = arith.mulf %10, %10 : vector<1x128xf32>
    %14 = arith.subf %12, %13 : vector<1x128xf32>
    %c128 = arith.constant 128 : index
    %c0_7 = arith.constant 0 : index
    %15 = vector.load %arg2[%c128, %c0_7] : memref<136x128xf32, #tpu.memory_space<vmem>>, vector<1x128xf32>
    %c129 = arith.constant 129 : index
    %c0_8 = arith.constant 0 : index
    %16 = vector.load %arg2[%c129, %c0_8] : memref<136x128xf32, #tpu.memory_space<vmem>>, vector<1x128xf32>
    %cst_9 = arith.constant 9.99999974E-6 : f32
    %17 = vector.broadcast %cst_9 : f32 to vector<1x128xf32>
    %18 = arith.addf %14, %17 : vector<1x128xf32>
    %19 = math.rsqrt %18 : vector<1x128xf32>
    %20 = arith.mulf %15, %19 : vector<1x128xf32>
    %21 = arith.mulf %10, %20 : vector<1x128xf32>
    %22 = arith.subf %16, %21 : vector<1x128xf32>
    %23 = vector.broadcast %20 : vector<1x128xf32> to vector<4x128xf32>
    %24 = arith.mulf %3, %23 : vector<4x128xf32>
    %25 = vector.broadcast %22 : vector<1x128xf32> to vector<4x128xf32>
    %26 = arith.addf %24, %25 : vector<4x128xf32>
    %c0_10 = arith.constant 0 : index
    %c0_11 = arith.constant 0 : index
    %27 = vector.load %arg2[%c0_10, %c0_11] : memref<136x128xf32, #tpu.memory_space<vmem>>, vector<128x128xf32>
    %28 = arith.truncf %27 : vector<128x128xf32> to vector<128x128xbf16>
    %c130 = arith.constant 130 : index
    %c0_12 = arith.constant 0 : index
    %29 = vector.load %arg2[%c130, %c0_12] : memref<136x128xf32, #tpu.memory_space<vmem>>, vector<1x128xf32>
    %30 = arith.truncf %26 : vector<4x128xf32> to vector<4x128xbf16>
    %cst_13 = arith.constant dense<0.000000e+00> : vector<4x128xf32>
    %31 = tpu.matmul %30, %28, %cst_13 {dimension_numbers = #tpu.dot_dimension_numbers<[1], [0], [0], [1], [0, 0, 1, 1], [], []>} : vector<4x128xbf16>, vector<128x128xbf16>, vector<4x128xf32> -> vector<4x128xf32>
    %32 = vector.broadcast %29 : vector<1x128xf32> to vector<4x128xf32>
    %33 = arith.addf %31, %32 : vector<4x128xf32>
    %cst_14 = arith.constant dense<0xFF800000> : vector<4xf32>
    %34 = vector.multi_reduction <maximumf>, %33, %cst_14 [1] : vector<4x128xf32> to vector<4xf32>
    %35 = vector.shape_cast %34 : vector<4xf32> to vector<4x1xf32>
    %36 = vector.broadcast %35 : vector<4x1xf32> to vector<4x128xf32>
    %37 = arith.subf %33, %36 : vector<4x128xf32>
    %38 = math.exp %37 : vector<4x128xf32>
    %cst_15 = arith.constant dense<0.000000e+00> : vector<4xf32>
    %39 = vector.multi_reduction <add>, %38, %cst_15 [1] : vector<4x128xf32> to vector<4xf32>
    %40 = vector.shape_cast %39 : vector<4xf32> to vector<4x1xf32>
    %41 = tpu.reciprocal %40 {approx = true} : vector<4x1xf32> -> vector<4x1xf32>
    %42 = vector.broadcast %41 : vector<4x1xf32> to vector<4x128xf32>
    %43 = arith.mulf %38, %42 : vector<4x128xf32>
    %c0_16 = arith.constant 0 : index
    %c0_17 = arith.constant 0 : index
    %44 = vector.load %arg3[%c0_16, %c0_17] : memref<4x128xf32, #tpu.memory_space<vmem>>, vector<4x128xf32>
    tpu.vector_store %arg3[%c0_16, %c0_17], %43 {strides = array<i32>} : memref<4x128xf32, #tpu.memory_space<vmem>>, vector<4x128xf32>,
    return
  }
}

</mosaic_0001>

<bundles_post_ra>
// kernel: tpu_custom_call.1
= control target key start
LH: loop header
LB: loop body
LE: loop exit
PB: predicated region body
PF: predicated region fallthrough
CT: control target
= control target key end

     0   :  { %8 = vsyncpa [#allocation3], 0  ;;  %s1328_s0 = inlined_call_operand.hbm [shape: f32[4,1024], index: 0, kind: input, shape index: {}]   ;;  %s1329_s1 = inlined_call_operand.hbm [shape: bf16[1024,128], index: 1, kind: input, shape index: {}]   ;;  %s1330_s2 = inlined_call_operand.hbm [shape: f32[136,128], index: 2, kind: input, shape index: {}]   ;;  %s1331_s3 = inlined_call_operand.hbm [shape: f32[4,128], index: 3, kind: output, shape index: {}]  }
   0x1   :  { %9 = vsyncpa [#allocation6], 0 }
   0x2   :  { %10 = vsyncpa [#allocation4], 0  ;;  %s1246_s12 = smov [#allocation5]   ;;  %s1152_s16 = scalar_lea.hbm %s1329_s1, 8192 }
   0x3   :  { %s26_s13 = sshll.u32 %s1246_s12, 4  ;;  %p1153_p0 = scmp.ne.s32.totalorder %s1329_s1, %s1152_s16  ;;  %s27_s13 = int_to_ptr.vmem [resolvable:$true] %s26_s13 }
   0x4   :  { %p1156_p1 = scmp.lt.u32.totalorder %s1152_s16, %s1329_s1 }
   0x6   :  { %p1158_p2 = pnand %p1156_p1, %p1153_p0 }
   0x8   :  { %1161 = shalt.err (!%p1158_p2)
}
   0x9   :  { %s1162_s21 = scalar_lea.vmem %s27_s13, 8192  ;;  %p1167_p4 = scmp.lt.s32.totalorder %s27_s13, %s27_s13 }
   0xa   :  { %p1163_p3 = scmp.ne.s32.totalorder %s27_s13, %s1162_s21  ;;  %p1168_p5 = scmp.lt.s32.totalorder %s1162_s21, %s1162_s21 }
   0xc   :  { %p1169_p6 = por %p1168_p5, %p1167_p4 }
   0xe   :  { %p1170_p7 = pnand %p1169_p6, %p1163_p3 }
  0x10   :  { %1173 = shalt.err (!%p1170_p7)
}
  0x11   :  { %s1247_s22 = smov 64   ;;  %s1248_s23 = smov 4  }
  0x12   :  { %32 = dma.hbm_to_vmem [thread:$0]  %s1329_s1, 8192, %s27_s13, [#allocation6], %s1247_s22, %s1247_s22, %s1248_s23  }
  0x13   :  { %s1249_s26 = smov [#allocation2]   ;;  %s1250_s28 = smov [#allocation7]  }
  0x14   :  { %s17_s27 = sshll.u32 %s1249_s26, 4  ;;  %s38_s29 = sshll.u32 %s1250_s28, 4  ;;  %s18_s27 = int_to_ptr.vmem [resolvable:$true] %s17_s27  ;;  %s39_s29 = int_to_ptr.vmem [resolvable:$true] %s38_s29 }
  0x15   :  { %s1174_s5 = scalar_lea.hbm %s1328_s0, 512 }
  0x16   :  { %p1175_p8 = scmp.ne.s32.totalorder %s1328_s0, %s1174_s5  ;;  %p1178_p9 = scmp.lt.u32.totalorder %s1174_s5, %s1328_s0 }
  0x18   :  { %p1180_p10 = pnand %p1178_p9, %p1175_p8 }
  0x1a   :  { %1183 = shalt.err (!%p1180_p10)
}
  0x1b   :  { %s1184_s1 = scalar_lea.vmem %s18_s27, 512  ;;  %p1189_p12 = scmp.lt.s32.totalorder %s18_s27, %s18_s27 }
  0x1c   :  { %p1185_p11 = scmp.ne.s32.totalorder %s18_s27, %s1184_s1  ;;  %p1190_p13 = scmp.lt.s32.totalorder %s1184_s1, %s1184_s1 }
  0x1e   :  { %p1191_p0 = por %p1190_p13, %p1189_p12 }
  0x20   :  { %p1192_p1 = pnand %p1191_p0, %p1185_p11 }
  0x22   :  { %1195 = shalt.err (!%p1192_p1)
}
  0x23   :  { %20 = dma.hbm_to_vmem [thread:$0]  %s1328_s0, 512, %s18_s27, [#allocation3]  }
  0x24   :  { %s1196_s14 = scalar_lea.hbm %s1330_s2, 2176 }
  0x25   :  { %p1197_p2 = scmp.ne.s32.totalorder %s1330_s2, %s1196_s14  ;;  %p1200_p3 = scmp.lt.u32.totalorder %s1196_s14, %s1330_s2 }
  0x27   :  { %p1202_p4 = pnand %p1200_p3, %p1197_p2 }
  0x29   :  { %1205 = shalt.err (!%p1202_p4)
}
  0x2a   :  { %s1206_s19 = scalar_lea.vmem %s39_s29, 2176  ;;  %p1211_p6 = scmp.lt.s32.totalorder %s39_s29, %s39_s29 }
  0x2b   :  { %p1207_p5 = scmp.ne.s32.totalorder %s39_s29, %s1206_s19  ;;  %p1212_p7 = scmp.lt.s32.totalorder %s1206_s19, %s1206_s19 }
  0x2d   :  { %p1213_p8 = por %p1212_p7, %p1211_p6 }
  0x2f   :  { %p1214_p9 = pnand %p1213_p8, %p1207_p5 }
  0x31   :  { %1217 = shalt.err (!%p1214_p9)
}
  0x32   :  { %s1251_s0 = smov 128   ;;  %s1252_s20 = smov 8  }
  0x33   :  { %44 = dma.hbm_to_vmem [thread:$0]  %s1330_s2, 2176, %s39_s29, [#allocation6], %s1251_s0, %s1251_s0, %s1252_s20  }
  0x34   :  { %1240 = dma.done.wait [#allocation3], 512  }
  0x35   :  { %1241 = vsyncadd [#allocation3], 4294966784 }
  0x36   :  { %1242 = dma.done.wait [#allocation6], 10368  }
  0x37   :  { %1243 = vsyncadd [#allocation6], 4294956928  ;;  %v1078_v0 = vld [vmem:[#allocation5 + $0x40] sm:$0xff]   ;;  %v1082_v4 = vld [vmem:[#allocation5 + $0x48] sm:$0xff]   ;;  %vm1254_vm0 = vmmov 0   ;;  %vm751_vm1 = vcmask 1043456  }
  0x38   :  { %v1079_v1 = vld [vmem:[#allocation5 + $0xc0] sm:$0xff]   ;;  %951 = vmatprep.subr.bf16.mxu0 %v1078_v0  ;;  %v1083_v5 = vld [vmem:[#allocation5 + $0xc8] sm:$0xff]   ;;  %v1086_v8 = vld [vmem:[#allocation5 + $0x50] sm:$0xff]   ;;  %s1255_s2 = smov [#allocation8]  }
  0x39   :  { %v1080_v2 = vld [vmem:[#allocation5] sm:$0xff]   ;;  %973 = vmatprep.subr.bf16.mxu1 %v1079_v1  ;;  %v1084_v6 = vld [vmem:[#allocation5 + $0x8] sm:$0xff]   ;;  %v1087_v9 = vld [vmem:[#allocation5 + $0xd0] sm:$0xff]   ;;  %s876_s23 = sshll.u32 %s1255_s2, 4  ;;  %s877_s23 = int_to_ptr.vmem [resolvable:$true] %s876_s23 }
  0x3a   :  { %v1081_v3 = vld [vmem:[#allocation5 + $0x80] sm:$0xff]   ;;  %952 = vmatpush3.bf16.msra.mxu0 %v1080_v2  ;;  %v1085_v7 = vld [vmem:[#allocation5 + $0x88] sm:$0xff]   ;;  %v1088_v10 = vld [vmem:[#allocation5 + $0x10] sm:$0xff]   ;;  %s1218_s24 = scalar_lea.vmem %s877_s23, 64  ;;  %p1223_p11 = scmp.lt.s32.totalorder %s877_s23, %s877_s23 }
  0x3b   :  { %974 = vmatpush3.bf16.msra.mxu1 %v1081_v3  ;;  %953 = vmatprep.subr.bf16.mxu0 %v1082_v4  ;;  %v1089_v11 = vld [vmem:[#allocation5 + $0x90] sm:$0xff]   ;;  %v1090_v12 = vld [vmem:[#allocation5 + $0x58] sm:$0xff]   ;;  %v1094_v16 = vld [vmem:[#allocation5 + $0x60] sm:$0xff]   ;;  %p1219_p10 = scmp.ne.s32.totalorder %s877_s23, %s1218_s24  ;;  %p1224_p12 = scmp.lt.s32.totalorder %s1218_s24, %s1218_s24 }
  0x3c   :  { %975 = vmatprep.subr.bf16.mxu1 %v1083_v5  ;;  %v1091_v13 = vld [vmem:[#allocation5 + $0xd8] sm:$0xff]   ;;  %v1095_v17 = vld [vmem:[#allocation5 + $0xe0] sm:$0xff]   ;;  %v1098_v20 = vld [vmem:[#allocation5 + $0x68] sm:$0xff]  }
  0x3d   :  { %v1092_v14 = vld [vmem:[#allocation5 + $0x18] sm:$0xff]   ;;  %v1096_v18 = vld [vmem:[#allocation5 + $0x20] sm:$0xff]   ;;  %v1099_v21 = vld [vmem:[#allocation5 + $0xe8] sm:$0xff]   ;;  %p1225_p13 = por %p1224_p12, %p1223_p11 }
  0x3e   :  { %954 = vmatpush3.bf16.msra.mxu0 %v1084_v6  ;;  %v1093_v15 = vld [vmem:[#allocation5 + $0x98] sm:$0xff]   ;;  %v1097_v19 = vld [vmem:[#allocation5 + $0xa0] sm:$0xff]   ;;  %v1100_v22 = vld [vmem:[#allocation5 + $0x28] sm:$0xff]  }
  0x3f   :  { %976 = vmatpush3.bf16.msra.mxu1 %v1085_v7  ;;  %955 = vmatprep.subr.bf16.mxu0 %v1086_v8  ;;  %v1101_v23 = vld [vmem:[#allocation5 + $0xa8] sm:$0xff]   ;;  %v1102_v24 = vld [vmem:[#allocation5 + $0x70] sm:$0xff]   ;;  %v1106_v28 = vld [vmem:[#allocation5 + $0x78] sm:$0xff]   ;;  %p1226_p0 = pnand %p1225_p13, %p1219_p10 }
  0x40   :  { %977 = vmatprep.subr.bf16.mxu1 %v1087_v9  ;;  %v1103_v25 = vld [vmem:[#allocation5 + $0xf0] sm:$0xff]   ;;  %v1107_v29 = vld [vmem:[#allocation5 + $0xf8] sm:$0xff]   ;;  %v55_v32 = vld [vmem:[#allocation2] sm:$0xff] }
  0x41   :  { %v1104_v26 = vld [vmem:[#allocation5 + $0x30] sm:$0xff]   ;;  %v1108_v30 = vld [vmem:[#allocation5 + $0x38] sm:$0xff]   ;;  %v56_v33 = vld [vmem:[#allocation2 + $0x8] sm:$0xff]  ;;  %v63_v34 = vcombine.high %v55_v32, %v55_v32  ;;  %v71_v37 = vpack.c.bf16 %v55_v32, %v55_v32 }
  0x42   :  { %956 = vmatpush3.bf16.msra.mxu0 %v1088_v10  ;;  %v1105_v27 = vld [vmem:[#allocation5 + $0xb0] sm:$0xff]   ;;  %v1109_v31 = vld [vmem:[#allocation5 + $0xb8] sm:$0xff]   ;;  %v64_v35 = vcombine.high %v56_v33, %v56_v33  ;;  %v1112_v36 = vld [vmem:[#allocation5 + $0x140] sm:$0xff]   ;;  %v73_v38 = vpack.c.bf16 %v56_v33, %v56_v33 }
  0x43   :  { %978 = vmatpush3.bf16.msra.mxu1 %v1089_v11  ;;  %957 = vmatprep.subr.bf16.mxu0 %v1090_v12  ;;  %v1113_v39 = vld [vmem:[#allocation5 + $0x1c0] sm:$0xff]   ;;  %v72_v40 = vpack.c.bf16 %v63_v34, %v63_v34  ;;  %v1116_v44 = vld [vmem:[#allocation5 + $0x148] sm:$0xff]   ;;  %v1120_v48 = vld [vmem:[#allocation5 + $0x150] sm:$0xff]  }
  0x44   :  { %979 = vmatprep.subr.bf16.mxu1 %v1091_v13  ;;  %v74_v41 = vpack.c.bf16 %v64_v35, %v64_v35  ;;  %v1114_v42 = vld [vmem:[#allocation5 + $0x100] sm:$0xff]   ;;  %v1117_v45 = vld [vmem:[#allocation5 + $0x1c8] sm:$0xff]   ;;  %v1121_v49 = vld [vmem:[#allocation5 + $0x1d0] sm:$0xff]  }
  0x45   :  { %v1115_v43 = vld [vmem:[#allocation5 + $0x180] sm:$0xff]   ;;  %623 = vmatprep.mubr.bf16.mxu0 %v72_v40  ;;  %v1118_v46 = vld [vmem:[#allocation5 + $0x108] sm:$0xff]   ;;  %v1122_v50 = vld [vmem:[#allocation5 + $0x110] sm:$0xff]  }
  0x46   :  { %958 = vmatpush3.bf16.msra.mxu0 %v1092_v14  ;;  %663 = vmatprep.mubr.bf16.mxu1 %v74_v41  ;;  %v1119_v47 = vld [vmem:[#allocation5 + $0x188] sm:$0xff]   ;;  %v1123_v51 = vld [vmem:[#allocation5 + $0x190] sm:$0xff]   ;;  %v1124_v52 = vld [vmem:[#allocation5 + $0x158] sm:$0xff]  }
  0x47   :  { %980 = vmatpush3.bf16.msra.mxu1 %v1093_v15  ;;  %959 = vmatprep.subr.bf16.mxu0 %v1094_v16  ;;  %v1125_v53 = vld [vmem:[#allocation5 + $0x1d8] sm:$0xff]   ;;  %v1128_v56 = vld [vmem:[#allocation5 + $0x160] sm:$0xff]   ;;  %v1132_v60 = vld [vmem:[#allocation5 + $0x168] sm:$0xff]  }
  0x48   :  { %981 = vmatprep.subr.bf16.mxu1 %v1095_v17  ;;  %v1126_v54 = vld [vmem:[#allocation5 + $0x118] sm:$0xff]   ;;  %v1129_v57 = vld [vmem:[#allocation5 + $0x1e0] sm:$0xff]   ;;  %v1133_v61 = vld [vmem:[#allocation5 + $0x1e8] sm:$0xff]  }
  0x49   :  { %v1127_v55 = vld [vmem:[#allocation5 + $0x198] sm:$0xff]   ;;  %v1130_v58 = vld [vmem:[#allocation5 + $0x120] sm:$0xff]   ;;  %v1134_v62 = vld [vmem:[#allocation5 + $0x128] sm:$0xff]  }
  0x4a   :  { %960 = vmatpush3.bf16.msra.mxu0 %v1096_v18  ;;  %v1131_v59 = vld [vmem:[#allocation5 + $0x1a0] sm:$0xff]   ;;  %v1135_v63 = vld [vmem:[#allocation5 + $0x1a8] sm:$0xff]   ;;  %v1136_v0 = vld [vmem:[#allocation5 + $0x170] sm:$0xff]  }
  0x4b   :  { %982 = vmatpush3.bf16.msra.mxu1 %v1097_v19  ;;  %961 = vmatprep.subr.bf16.mxu0 %v1098_v20  ;;  %v1137_v1 = vld [vmem:[#allocation5 + $0x1f0] sm:$0xff]   ;;  %v1140_v4 = vld [vmem:[#allocation5 + $0x178] sm:$0xff]   ;;  %v788_v16 = vld [vmem:[#allocation7] sm:$0xff]  ;;  %v1253_v19 = vmov 0.0  }
  0x4c   :  { %983 = vmatprep.subr.bf16.mxu1 %v1099_v21  ;;  %v1138_v2 = vld [vmem:[#allocation5 + $0x130] sm:$0xff]   ;;  %v1141_v5 = vld [vmem:[#allocation5 + $0x1f8] sm:$0xff]   ;;  %v789_v17 = vld [vmem:[#allocation7 + $0x8] sm:$0xff] }
  0x4d   :  { %v1139_v3 = vld [vmem:[#allocation5 + $0x1b0] sm:$0xff]   ;;  %v1142_v6 = vld [vmem:[#allocation5 + $0x138] sm:$0xff]   ;;  %v804_v18 = vpack.c.bf16 %v789_v17, %v788_v16  ;;  %v800_v35 = vld [vmem:[#allocation7 + $0x60] sm:$0xff] }
  0x4e   :  { %962 = vmatpush3.bf16.msra.mxu0 %v1100_v22  ;;  %v1143_v7 = vld [vmem:[#allocation5 + $0x1b8] sm:$0xff]   ;;  %v57_v8 = vld [vmem:[#allocation2 + $0x10] sm:$0xff] }
  0x4f   :  { %984 = vmatpush3.bf16.msra.mxu1 %v1101_v23  ;;  %963 = vmatprep.subr.bf16.mxu0 %v1102_v24  ;;  %v65_v9 = vcombine.high %v57_v8, %v57_v8  ;;  %v58_v10 = vld [vmem:[#allocation2 + $0x18] sm:$0xff]  ;;  %v75_v11 = vpack.c.bf16 %v57_v8, %v57_v8  ;;  %v790_v20 = vld [vmem:[#allocation7 + $0x10] sm:$0xff]  ;;  %v792_v23 = vld [vmem:[#allocation7 + $0x20] sm:$0xff] }
  0x50   :  { %985 = vmatprep.subr.bf16.mxu1 %v1103_v25  ;;  %v66_v12 = vcombine.high %v58_v10, %v58_v10  ;;  %v77_v14 = vpack.c.bf16 %v58_v10, %v58_v10  ;;  %v791_v21 = vld [vmem:[#allocation7 + $0x18] sm:$0xff]  ;;  %v793_v24 = vld [vmem:[#allocation7 + $0x28] sm:$0xff]  ;;  %v798_v32 = vld [vmem:[#allocation7 + $0x50] sm:$0xff] }
  0x51   :  { %v76_v13 = vpack.c.bf16 %v65_v9, %v65_v9  ;;  %v805_v22 = vpack.c.bf16 %v791_v21, %v790_v20  ;;  %v806_v25 = vpack.c.bf16 %v793_v24, %v792_v23  ;;  %v799_v33 = vld [vmem:[#allocation7 + $0x58] sm:$0xff]  ;;  %v778_v20 = vlaneseq }
  0x52   :  { %964 = vmatpush3.bf16.msra.mxu0 %v1104_v26  ;;  %v78_v15 = vpack.c.bf16 %v66_v12, %v66_v12  ;;  %v794_v26 = vld [vmem:[#allocation7 + $0x30] sm:$0xff]  ;;  %v809_v34 = vpack.c.bf16 %v799_v33, %v798_v32 }
  0x53   :  { %986 = vmatpush3.bf16.msra.mxu1 %v1105_v27  ;;  %965 = vmatprep.subr.bf16.mxu0 %v1106_v28  ;;  %v795_v27 = vld [vmem:[#allocation7 + $0x38] sm:$0xff]  ;;  %v779_v21 = vshrl.u32 %v778_v20, 7 }
  0x54   :  { %987 = vmatprep.subr.bf16.mxu1 %v1107_v29  ;;  %v807_v28 = vpack.c.bf16 %v795_v27, %v794_v26  ;;  %v796_v29 = vld [vmem:[#allocation7 + $0x40] sm:$0xff] }
  0x55   :  { %v780_v23 = vsub.s32 0, %v779_v21  ;;  %v772_v26 = vld [vmem:[#allocation7 + $0x81] sm:$0x1] }
  0x56   :  { %966 = vmatpush3.bf16.msra.mxu0 %v1108_v30  ;;  %v797_v30 = vld [vmem:[#allocation7 + $0x48] sm:$0xff] }
  0x57   :  { %988 = vmatpush3.bf16.msra.mxu1 %v1109_v31  ;;  %995 = vmatprep.subr.bf16.mxu0 %v1112_v36  ;;  %v808_v31 = vpack.c.bf16 %v797_v30, %v796_v29  ;;  %v801_v36 = vld [vmem:[#allocation7 + $0x68] sm:$0xff] }
  0x58   :  { %1017 = vmatprep.subr.bf16.mxu1 %v1113_v39  ;;  %v803_v39 = vld [vmem:[#allocation7 + $0x78] sm:$0xff] }
  0x59   :  { %624 = vmatmul.mubr.bf16.vlgmr.msra.gmra.mrb[0].mxu0 %v71_v37  ;;  %v810_v37 = vpack.c.bf16 %v801_v36, %v800_v35 }
  0x5a   :  { %664 = vmatmul.mubr.bf16.vlgmr.msra.gmra.mrb[0].mxu1 %v73_v38  ;;  %996 = vmatpush3.bf16.msra.mxu0 %v1114_v42  ;;  %v802_v38 = vld [vmem:[#allocation7 + $0x70] sm:$0xff] }
  0x5b   :  { %1018 = vmatpush3.bf16.msra.mxu1 %v1115_v43  ;;  %997 = vmatprep.subr.bf16.mxu0 %v1116_v44  ;;  %v811_v40 = vpack.c.bf16 %v803_v39, %v802_v38 }
  0x5c   :  { %1019 = vmatprep.subr.bf16.mxu1 %v1117_v45  ;;  %703 = vmatprep.mubr.bf16.mxu0 %v76_v13 }
  0x5d   :  { %743 = vmatprep.mubr.bf16.mxu1 %v78_v15 }
  0x5e   :  { %998 = vmatpush3.bf16.msra.mxu0 %v1118_v46 }
  0x5f   :  { %1020 = vmatpush3.bf16.msra.mxu1 %v1119_v47  ;;  %999 = vmatprep.subr.bf16.mxu0 %v1120_v48 }
  0x60   :  { %1021 = vmatprep.subr.bf16.mxu1 %v1121_v49 }
  0x62   :  { %1000 = vmatpush3.bf16.msra.mxu0 %v1122_v50 }
  0x63   :  { %1022 = vmatpush3.bf16.msra.mxu1 %v1123_v51  ;;  %1001 = vmatprep.subr.bf16.mxu0 %v1124_v52 }
  0x64   :  { %1023 = vmatprep.subr.bf16.mxu1 %v1125_v53 }
  0x66   :  { %1002 = vmatpush3.bf16.msra.mxu0 %v1126_v54 }
  0x67   :  { %1024 = vmatpush3.bf16.msra.mxu1 %v1127_v55  ;;  %1003 = vmatprep.subr.bf16.mxu0 %v1128_v56 }
  0x68   :  { %1025 = vmatprep.subr.bf16.mxu1 %v1129_v57 }
  0x6a   :  { %1004 = vmatpush3.bf16.msra.mxu0 %v1130_v58 }
  0x6b   :  { %1026 = vmatpush3.bf16.msra.mxu1 %v1131_v59  ;;  %1005 = vmatprep.subr.bf16.mxu0 %v1132_v60 }
  0x6c   :  { %1027 = vmatprep.subr.bf16.mxu1 %v1133_v61 }
  0x6e   :  { %1006 = vmatpush3.bf16.msra.mxu0 %v1134_v62 }
  0x6f   :  { %1028 = vmatpush3.bf16.msra.mxu1 %v1135_v63  ;;  %1007 = vmatprep.subr.bf16.mxu0 %v1136_v0 }
  0x70   :  { %1029 = vmatprep.subr.bf16.mxu1 %v1137_v1 }
  0x72   :  { %1008 = vmatpush3.bf16.msra.mxu0 %v1138_v2 }
  0x73   :  { %1030 = vmatpush3.bf16.msra.mxu1 %v1139_v3  ;;  %1009 = vmatprep.subr.bf16.mxu0 %v1140_v4 }
  0x74   :  { %1031 = vmatprep.subr.bf16.mxu1 %v1141_v5 }
  0x76   :  { %1010 = vmatpush3.bf16.msra.mxu0 %v1142_v6 }
  0x77   :  { %1032 = vmatpush3.bf16.msra.mxu1 %v1143_v7  ;;  %1048 = vmatprep.subr.bf16.mxu0 %v1253_v19 }
  0x79   :  { %704 = vmatmul.mubr.bf16.vlgmr.msra.gmra.mrb[4].mxu0 %v75_v11 }
  0x7a   :  { %744 = vmatmul.mubr.bf16.vlgmr.msra.gmra.mrb[4].mxu1 %v77_v14  ;;  %1049 = vmatpush3.bf16.msra.mxu0 %v804_v18 }
  0x7b   :  { %1050 = vmatprep.subr.bf16.mxu0 %v1253_v19  ;;  %1064 = vmatprep.mubr.msk.bf16.mxu0 %vm1254_vm0, %v1253_v19 }
  0x7e   :  { %1051 = vmatpush3.bf16.msra.mxu0 %v805_v22  ;;  %v771_v22 = vld [vmem:[#allocation7 + $0x80] sm:$0x1] }
  0x7f   :  { %1052 = vmatprep.subr.bf16.mxu0 %v1253_v19 }
  0x82   :  { %1053 = vmatpush3.bf16.msra.mxu0 %v806_v25 }
  0x83   :  { %1054 = vmatprep.subr.bf16.mxu0 %v1253_v19 }
  0x86   :  { %1055 = vmatpush3.bf16.msra.mxu0 %v807_v28 }
  0x87   :  { %1056 = vmatprep.subr.bf16.mxu0 %v1253_v19 }
  0x8a   :  { %1057 = vmatpush3.bf16.msra.mxu0 %v808_v31 }
  0x8b   :  { %1058 = vmatprep.subr.bf16.mxu0 %v1253_v19 }
  0x8e   :  { %1059 = vmatpush3.bf16.msra.mxu0 %v809_v34  ;;  %v950_v34 = vld [vmem:[#allocation7 + $0x82] ss:$0 sm:$0xff] }
  0x8f   :  { %1060 = vmatprep.subr.bf16.mxu0 %v1253_v19 }
  0x92   :  { %1061 = vmatpush3.bf16.msra.mxu0 %v810_v37 }
  0x93   :  { %1062 = vmatprep.subr.bf16.mxu0 %v1253_v19 }
  0x96   :  { %1063 = vmatpush3.bf16.msra.mxu0 %v811_v40 }
 0x12c   :  { %v967_v41 = vpop.f32.mrb[0].mxu0 }
 0x12d   :  { %v989_v42 = vpop.f32.mrb[0].mxu1  ;;  %v968_v43 = vpop.f32.mrb[1].mxu0 }
 0x12e   :  { %v990_v44 = vpop.f32.mrb[1].mxu1  ;;  %v969_v45 = vadd.f32 %v968_v43, %v967_v41  ;;  %v970_v47 = vpop.f32.mrb[2].mxu0 }
 0x12f   :  { %v991_v46 = vadd.f32 %v990_v44, %v989_v42  ;;  %v992_v48 = vpop.f32.mrb[2].mxu1  ;;  %v971_v49 = vpop.f32.mrb[3].mxu0 }
 0x130   :  { %v993_v50 = vpop.f32.mrb[3].mxu1 }
 0x131   :  { %v666_v51 = vadd.f32 %v991_v46, %v969_v45 }
 0x14c   :  { %v1011_v52 = vpop.f32.mrb[4].mxu0 }
 0x14d   :  { %v1033_v53 = vpop.f32.mrb[4].mxu1  ;;  %v1012_v54 = vpop.f32.mrb[5].mxu0 }
 0x14e   :  { %v1013_v55 = vadd.f32 %v1012_v54, %v1011_v52  ;;  %v1034_v56 = vpop.f32.mrb[5].mxu1  ;;  %v1014_v57 = vpop.f32.mrb[6].mxu0 }
 0x14f   :  { %v1035_v58 = vadd.f32 %v1034_v56, %v1033_v53  ;;  %v1036_v59 = vpop.f32.mrb[6].mxu1  ;;  %v1015_v60 = vpop.f32.mrb[7].mxu0 }
 0x150   :  { %v706_v61 = vadd.f32 %v1013_v55, %v666_v51  ;;  %v1037_v62 = vpop.f32.mrb[7].mxu1 }
 0x152   :  { %v746_v63 = vadd.f32 %v1035_v58, %v706_v61 }
 0x154   :  { %v752_v0 = vsel %vm751_vm1, %v746_v63, 0.0  ;;  %v759_v1 = vmul.f32 %v746_v63, %v746_v63 }
 0x155   :  { %v753_v2 = vrot.slane %v752_v0, 4 }
 0x156   :  { %v760_v3 = vsel %vm751_vm1, %v759_v1, 0.0 }
 0x157   :  { %v754_v4 = vadd.f32 %v753_v2, %v752_v0  ;;  %v761_v5 = vrot.slane %v760_v3, 4 }
 0x159   :  { %v755_v6 = vrot.slane %v754_v4, 2  ;;  %v762_v7 = vadd.f32 %v761_v5, %v760_v3 }
 0x15b   :  { %v756_v8 = vadd.f32 %v755_v6, %v754_v4  ;;  %v763_v9 = vrot.slane %v762_v7, 2 }
 0x15d   :  { %v757_v10 = vrot.slane %v756_v8, 1  ;;  %v764_v11 = vadd.f32 %v763_v9, %v762_v7 }
 0x15f   :  { %v758_v12 = vadd.f32 %v757_v10, %v756_v8  ;;  %v765_v13 = vrot.slane %v764_v11, 1 }
 0x161   :  { %v766_v14 = vadd.f32 %v765_v13, %v764_v11  ;;  %v767_v15 = vmul.f32 0.25, %v758_v12 }
 0x163   :  { %v768_v16 = vmul.f32 0.25, %v766_v14  ;;  %v769_v17 = vmul.f32 %v767_v15, %v767_v15 }
 0x165   :  { %v770_v18 = vsub.f32 %v768_v16, %v769_v17 }
 0x167   :  { %v773_v19 = vadd.f32 1e-05, %v770_v18 }
 0x169   :  { %1146 = vrsqrt.f32 %v773_v19 }
 0x173   :  { %v1147_v24 = vpop.eup %1146 }
 0x174   :  { %v775_v25 = vmul.f32 %v1147_v24, %v771_v22 }
 0x176   :  { %v776_v27 = vmul.f32 %v775_v25, %v767_v15  ;;  %v781_v28 = vrot.slane %v775_v25, %v780_v23 }
 0x178   :  { %v777_v29 = vsub.f32 %v772_v26, %v776_v27  ;;  %v782_v30 = vmul.f32 %v781_v28, %v746_v63 }
 0x17a   :  { %v786_v31 = vrot.slane %v777_v29, %v780_v23 }
 0x17c   :  { %v787_v32 = vadd.f32 %v786_v31, %v782_v30 }
 0x17e   :  { %v813_v33 = vpack.c.bf16 %v787_v32, %v787_v32 }
 0x180   :  { %1065 = vmatmul.mubr.bf16.vlgmr.msra.gmra.mrb[8].mxu0 %v813_v33 }
 0x253   :  { %v852_v35 = vpop.f32.mrb[8].mxu0 }
 0x254   :  { %v853_v36 = vadd.f32 %v950_v34, %v852_v35  ;;  %v1066_v37 = vpop.f32.mrb[9].mxu0 }
 0x255   :  { %v855_v38 = vpop.f32.mrb[10].mxu0 }
 0x256   :  { %v1067_v39 = vpop.f32.mrb[11].mxu0  ;;  %v858_v40 = vsel %vm751_vm1, %v853_v36, -inf }
 0x257   :  { %859 = vmax.xlane.f32.xlu0 %v858_v40 }
 0x2e4   :  { %v860_v41 = vpop.xlane.xlu0 %859 }
 0x2e5   :  { %v861_v42 = vsub.f32 %v853_v36, %v860_v41 }
 0x2e7   :  { %v862_v43 = vmul.f32 1.442695, %v861_v42 }
 0x2e9   :  { %1148 = vpow2.f32 %v862_v43 }
 0x2f3   :  { %v1149_v44 = vpop.eup %1148 }
 0x2f4   :  { %v864_v45 = vsel %vm751_vm1, %v1149_v44, 0.0 }
 0x2f5   :  { %865 = vadd.xlane.f32.xlu0 %v864_v45 }
 0x382   :  { %v866_v46 = vpop.xlane.xlu0 %865 }
 0x383   :  { %1150 = vrcp.f32 %v866_v46 }
 0x38d   :  { %v1151_v47 = vpop.eup %1150 }
 0x38e   :  { %v868_v48 = vmul.f32 %v1151_v47, %v1149_v44 }
 0x390   :  { %869 = vst [vmem:[#allocation8] sm:$0xf] %v868_v48 }
 0x391   :  { %1229 = shalt.err (!%p1226_p0)
}
 0x392   :  { %s1230_s27 = scalar_lea.hbm %s1331_s3, 64 }
 0x393   :  { %p1231_p1 = scmp.ne.s32.totalorder %s1331_s3, %s1230_s27  ;;  %p1234_p2 = scmp.lt.u32.totalorder %s1230_s27, %s1331_s3 }
 0x395   :  { %p1236_p3 = pnand %p1234_p2, %p1231_p1 }
 0x397   :  { %1239 = shalt.err (!%p1236_p3)
}
 0x398   :  { %879 = dma.vmem_to_hbm [thread:$0]  %s877_s23, 64, %s1331_s3, [#allocation4]  }
 0x399   :  { %1244 = dma.done.wait [#allocation4], 64  }
 0x39a   :  { %1245 = vsyncadd [#allocation4], 4294967232 }
 0x39b   :  { %883 = vsyncpa [#allocation3], 1 }
 0x39c   :  { %884 = vsyncpa [#allocation6], 1 }
 0x39d   :  { %885 = vsyncpa [#allocation4], 1 }

</bundles_post_ra>
